<compile_context>
chip_gen: v7x
topology: tpu7x:2x2x1
jax: 0.10.0
libtpu: 0.0.40
codegen_flags: <defaults>
</compile_context>

<pallas_src>
import functools

import jax
import jax.numpy as jnp
from jax.experimental import pallas as pl
from jax.experimental.pallas import tpu as pltpu


def _round_up(x, m):
    return (x + m - 1) // m * m


_ACTIVATIONS = {
    "relu": lambda h: jnp.maximum(h, 0.0),
    "gelu": jax.nn.gelu,
}
# TODO(synk): arbitrary user-supplied Callable activations from the PyTorch module
# are not representable here; only named activations (relu/gelu) are supported.


def _ffn_kernel(x_ref, w1_ref, b1_ref, w2_ref, b2_ref, o_ref, acc_ref, *, activation):
    """One (token-tile, d_ff-tile) grid step of the fused FFN."""
    n = pl.program_id(1)

    @pl.when(n == 0)
    def _():
        acc_ref[...] = jnp.zeros_like(acc_ref)

    # First matmul: (tm, d_model) @ (d_model, tf), native-dtype operands on the
    # MXU with f32 accumulation.
    h = jnp.dot(x_ref[...], w1_ref[...], preferred_element_type=jnp.float32)
    # Bias + activation stay in f32 for accuracy.
    h = _ACTIVATIONS[activation](h + b1_ref[...].astype(jnp.float32))

    # Second matmul partial product, accumulated across the d_ff grid axis.
    acc_ref[...] += jnp.dot(h.astype(w2_ref.dtype), w2_ref[...],
                            preferred_element_type=jnp.float32)

    @pl.when(n == pl.num_programs(1) - 1)
    def _():
        o_ref[...] = (acc_ref[...] + b2_ref[...].astype(jnp.float32)).astype(o_ref.dtype)


@functools.partial(jax.jit, static_argnames=("activation", "tm", "tf"))
def position_wise_ffn(x, w1, b1, w2, b2, *, activation="relu", tm=256, tf=512):
    """x: (B, S, d_model); w1: (d_model, d_ff); b1: (d_ff,);
    w2: (d_ff, d_model); b2: (d_model,). Returns (B, S, d_model)."""
    B, S, d_model = x.shape
    d_ff = w1.shape[1]
    M = B * S

    # --- Tile / padding selection (all static Python ints at trace time) ---
    dmp = _round_up(d_model, 128)                 # lane-align d_model
    dfp0 = _round_up(d_ff, 128)                   # lane-align d_ff
    tf = _round_up(min(tf, dfp0), 128)            # d_ff tile, multiple of 128
    dfp = _round_up(dfp0, tf)                     # pad d_ff so tf divides it
    tm = min(tm, _round_up(M, 8))                 # row tile (sublane aligned)
    Mp = _round_up(M, tm)                         # pad token count to the tile

    # --- Pad inputs (zero padding is exact: padded cols/rows contribute 0) ---
    x2 = jnp.pad(x.reshape(M, d_model), ((0, Mp - M), (0, dmp - d_model)))
    w1p = jnp.pad(w1, ((0, dmp - d_model), (0, dfp - d_ff)))
    b1p = jnp.pad(b1, (0, dfp - d_ff)).reshape(1, dfp)
    w2p = jnp.pad(w2, ((0, dfp - d_ff), (0, dmp - d_model)))
    b2p = jnp.pad(b2, (0, dmp - d_model)).reshape(1, dmp)

    grid = (Mp // tm, dfp // tf)

    # --- VMEM budget (double-buffered tiles + f32 accumulator) ---
    xi, w1i, w2i = x.dtype.itemsize, w1.dtype.itemsize, w2.dtype.itemsize
    est = (2 * tm * dmp * xi            # x tiles
           + 2 * tm * dmp * xi          # output tiles
           + 2 * dmp * tf * w1i         # W1 slabs
           + 2 * tf * dmp * w2i         # W2 slabs
           + 2 * (tf + dmp) * 4         # biases
           + tm * tf * 4                # h intermediate
           + tm * dmp * 4)              # accumulator
    vmem_bytes = int(min(max(2 * est, 32 * 1024 * 1024), 60 * 1024 * 1024))

    cost = pl.CostEstimate(
        flops=int(4.0 * M * d_model * d_ff),      # two matmuls, 2 flops/MAC
        transcendentals=0,
        bytes_accessed=int((x.size + w1.size + w2.size + b1.size + b2.size) * xi
                           + M * d_model * xi),
    )

    kernel = functools.partial(_ffn_kernel, activation=activation)

    out2 = pl.pallas_call(
        kernel,
        out_shape=jax.ShapeDtypeStruct((Mp, dmp), x.dtype),
        grid_spec=pltpu.PrefetchScalarGridSpec(
            num_scalar_prefetch=0,
            grid=grid,
            in_specs=[
                pl.BlockSpec((tm, dmp), lambda i, n: (i, 0)),    # x tile (reused across n)
                pl.BlockSpec((dmp, tf), lambda i, n: (0, n)),    # W1 column slab
                pl.BlockSpec((1, tf), lambda i, n: (0, n)),      # b1 slab
                pl.BlockSpec((tf, dmp), lambda i, n: (n, 0)),    # W2 row slab
                pl.BlockSpec((1, dmp), lambda i, n: (0, 0)),     # b2 (resident)
            ],
            out_specs=pl.BlockSpec((tm, dmp), lambda i, n: (i, 0)),
            scratch_shapes=[pltpu.VMEM((tm, dmp), jnp.float32)],
        ),
        compiler_params=pltpu.CompilerParams(
            dimension_semantics=("parallel", "arbitrary"),
            vmem_limit_bytes=vmem_bytes,
        ),
        cost_estimate=cost,
    )(x2, w1p, b1p, w2p, b2p)

    return out2[:M, :d_model].reshape(B, S, d_model)


def _reference_ffn(x, w1, b1, w2, b2):
    h = jnp.einsum("bsd,df->bsf", x, w1) + b1
    h = jnp.maximum(h, 0.0)
    return jnp.einsum("bsf,fd->bsd", h, w2) + b2


if __name__ == "__main__":
    # Small shapes consistent with the module: position-wise FFN over tokens.
    batch, seq, d_model, d_ff = 2, 8, 32, 64

    key = jax.random.PRNGKey(0)
    kx, kw1, kb1, kw2, kb2 = jax.random.split(key, 5)

    x = jax.random.normal(kx, (batch, seq, d_model), dtype=jnp.float32)
    # PyTorch Linear shapes: W1 (d_ff, d_model), W2 (d_model, d_ff);
    # stored here pre-transposed as (in, out) so the kernel computes x @ W.
    w1 = jax.random.normal(kw1, (d_model, d_ff), dtype=jnp.float32) * 0.1
    b1 = jax.random.normal(kb1, (d_ff,), dtype=jnp.float32) * 0.1
    w2 = jax.random.normal(kw2, (d_ff, d_model), dtype=jnp.float32) * 0.1
    b2 = jax.random.normal(kb2, (d_model,), dtype=jnp.float32) * 0.1

    out = position_wise_ffn(x, w1, b1, w2, b2, activation="relu")
    out = jax.block_until_ready(out)

    ref = _reference_ffn(x, w1, b1, w2, b2)
    assert out.shape == (batch, seq, d_model)
    assert jnp.allclose(out, ref, atol=1e-5, rtol=1e-5), "mismatch vs reference"

    print("KERNEL_OK")
</pallas_src>

<mosaic_0001>
module attributes {stable_mosaic.version = 11 : i64} {
  func.func @_ffn_kernel(%arg0: i32, %arg1: i32, %arg2: memref<16x128xf32, #tpu.memory_space<vmem>>, %arg3: memref<128x128xf32, #tpu.memory_space<vmem>>, %arg4: memref<1x128xf32, #tpu.memory_space<vmem>>, %arg5: memref<128x128xf32, #tpu.memory_space<vmem>>, %arg6: memref<1x128xf32, #tpu.memory_space<vmem>>, %arg7: memref<16x128xf32, #tpu.memory_space<vmem>>, %arg8: memref<16x128xf32, #tpu.memory_space<vmem>>) attributes {dimension_semantics = [#tpu.dimension_semantics<parallel>, #tpu.dimension_semantics<arbitrary>], iteration_bounds = array<i64: 1, 1>, scalar_prefetch = 0 : i64, scratch_operands = 1 : i64, tpu.core_type = #tpu.core_type<tc>, window_params = [{transform_indices = @transform_0, window_bounds = array<i64: 16, 128>}, {transform_indices = @transform_1, window_bounds = array<i64: 128, 128>}, {transform_indices = @transform_2, window_bounds = array<i64: 1, 128>}, {transform_indices = @transform_3, window_bounds = array<i64: 128, 128>}, {pipeline_mode = #tpu.pipeline_mode<synchronous>, transform_indices = @transform_4, window_bounds = array<i64: 1, 128>}, {transform_indices = @transform_5, window_bounds = array<i64: 16, 128>}]} {
    %c0_i32 = arith.constant 0 : i32
    %0 = arith.cmpi eq, %arg1, %c0_i32 : i32
    %1 = arith.extui %0 : i1 to i32
    %c0_i32_0 = arith.constant 0 : i32
    %2 = arith.cmpi ne, %1, %c0_i32_0 : i32
    scf.if %2 {
      %cst_16 = arith.constant 0.000000e+00 : f32
      %19 = vector.broadcast %cst_16 : f32 to vector<16x128xf32>
      %c0_17 = arith.constant 0 : index
      %c0_18 = arith.constant 0 : index
      %20 = vector.load %arg8[%c0_17, %c0_18] : memref<16x128xf32, #tpu.memory_space<vmem>>, vector<16x128xf32>
      tpu.vector_store %arg8[%c0_17, %c0_18], %19 {strides = array<i32>} : memref<16x128xf32, #tpu.memory_space<vmem>>, vector<16x128xf32>,
    } else {
    }
    %c0 = arith.constant 0 : index
    %c0_1 = arith.constant 0 : index
    %3 = vector.load %arg2[%c0, %c0_1] : memref<16x128xf32, #tpu.memory_space<vmem>>, vector<16x128xf32>
    %c0_2 = arith.constant 0 : index
    %c0_3 = arith.constant 0 : index
    %4 = vector.load %arg3[%c0_2, %c0_3] : memref<128x128xf32, #tpu.memory_space<vmem>>, vector<128x128xf32>
    %cst = arith.constant dense<0.000000e+00> : vector<16x128xf32>
    %5 = tpu.matmul %3, %4, %cst {dimension_numbers = #tpu.dot_dimension_numbers<[1], [0], [0], [1], [0, 0, 1, 1], [], []>} : vector<16x128xf32>, vector<128x128xf32>, vector<16x128xf32> -> vector<16x128xf32>
    %c0_4 = arith.constant 0 : index
    %c0_5 = arith.constant 0 : index
    %6 = vector.load %arg4[%c0_4, %c0_5] : memref<1x128xf32, #tpu.memory_space<vmem>>, vector<1x128xf32>
    %7 = vector.broadcast %6 : vector<1x128xf32> to vector<16x128xf32>
    %8 = arith.addf %5, %7 : vector<16x128xf32>
    %cst_6 = arith.constant 0.000000e+00 : f32
    %9 = vector.broadcast %cst_6 : f32 to vector<16x128xf32>
    %10 = arith.maximumf %8, %9 : vector<16x128xf32>
    %c0_7 = arith.constant 0 : index
    %c0_8 = arith.constant 0 : index
    %11 = vector.load %arg8[%c0_7, %c0_8] : memref<16x128xf32, #tpu.memory_space<vmem>>, vector<16x128xf32>
    %c0_9 = arith.constant 0 : index
    %c0_10 = arith.constant 0 : index
    %12 = vector.load %arg5[%c0_9, %c0_10] : memref<128x128xf32, #tpu.memory_space<vmem>>, vector<128x128xf32>
    %cst_11 = arith.constant dense<0.000000e+00> : vector<16x128xf32>
    %13 = tpu.matmul %10, %12, %cst_11 {dimension_numbers = #tpu.dot_dimension_numbers<[1], [0], [0], [1], [0, 0, 1, 1], [], []>} : vector<16x128xf32>, vector<128x128xf32>, vector<16x128xf32> -> vector<16x128xf32>
    %14 = arith.addf %11, %13 : vector<16x128xf32>
    %c0_12 = arith.constant 0 : index
    %c0_13 = arith.constant 0 : index
    %15 = vector.load %arg8[%c0_12, %c0_13] : memref<16x128xf32, #tpu.memory_space<vmem>>, vector<16x128xf32>
    tpu.vector_store %arg8[%c0_12, %c0_13], %14 {strides = array<i32>} : memref<16x128xf32, #tpu.memory_space<vmem>>, vector<16x128xf32>,
    %c0_i32_14 = arith.constant 0 : i32
    %16 = arith.cmpi eq, %arg1, %c0_i32_14 : i32
    %17 = arith.extui %16 : i1 to i32
    %c0_i32_15 = arith.constant 0 : i32
    %18 = arith.cmpi ne, %17, %c0_i32_15 : i32
    scf.if %18 {
      %c0_16 = arith.constant 0 : index
      %c0_17 = arith.constant 0 : index
      %19 = vector.load %arg8[%c0_16, %c0_17] : memref<16x128xf32, #tpu.memory_space<vmem>>, vector<16x128xf32>
      %c0_18 = arith.constant 0 : index
      %c0_19 = arith.constant 0 : index
      %20 = vector.load %arg6[%c0_18, %c0_19] : memref<1x128xf32, #tpu.memory_space<vmem>>, vector<1x128xf32>
      %21 = vector.broadcast %20 : vector<1x128xf32> to vector<16x128xf32>
      %22 = arith.addf %19, %21 : vector<16x128xf32>
      %c0_20 = arith.constant 0 : index
      %c0_21 = arith.constant 0 : index
      %23 = vector.load %arg7[%c0_20, %c0_21] : memref<16x128xf32, #tpu.memory_space<vmem>>, vector<16x128xf32>
      tpu.vector_store %arg7[%c0_20, %c0_21], %22 {strides = array<i32>} : memref<16x128xf32, #tpu.memory_space<vmem>>, vector<16x128xf32>,
    } else {
    }
    return
  }
  func.func @transform_0(%arg0: i32, %arg1: i32) -> (i32, i32) {
    %c0_i32 = arith.constant 0 : i32
    %c0_i32_0 = arith.constant 0 : i32
    return %arg0, %c0_i32 : i32, i32
  }
  func.func @transform_1(%arg0: i32, %arg1: i32) -> (i32, i32) {
    %c0_i32 = arith.constant 0 : i32
    %c0_i32_0 = arith.constant 0 : i32
    return %c0_i32, %arg1 : i32, i32
  }
  func.func @transform_2(%arg0: i32, %arg1: i32) -> (i32, i32) {
    %c0_i32 = arith.constant 0 : i32
    %c0_i32_0 = arith.constant 0 : i32
    return %c0_i32, %arg1 : i32, i32
  }
  func.func @transform_3(%arg0: i32, %arg1: i32) -> (i32, i32) {
    %c0_i32 = arith.constant 0 : i32
    %c0_i32_0 = arith.constant 0 : i32
    return %arg1, %c0_i32 : i32, i32
  }
  func.func @transform_4(%arg0: i32, %arg1: i32) -> (i32, i32) {
    %c0_i32 = arith.constant 0 : i32
    %c0_i32_0 = arith.constant 0 : i32
    %c0_i32_1 = arith.constant 0 : i32
    return %c0_i32, %c0_i32_0 : i32, i32
  }
  func.func @transform_5(%arg0: i32, %arg1: i32) -> (i32, i32) {
    %c0_i32 = arith.constant 0 : i32
    %c0_i32_0 = arith.constant 0 : i32
    return %arg0, %c0_i32 : i32, i32
  }
}

</mosaic_0001>

<bundles_post_ra>
// kernel: position_wise_ffn.1
= control target key start
LH: loop header
LB: loop body
LE: loop exit
PB: predicated region body
PF: predicated region fallthrough
CT: control target
= control target key end

     0   :  { %s561_s1 = inlined_call_operand.vmem [shape: f32[128,128], index: 1, kind: input, shape index: {}]   ;;  %s562_s0 = inlined_call_operand.vmem [shape: f32[16,128], index: 0, kind: input, shape index: {}]   ;;  %s563_s3 = inlined_call_operand.vmem [shape: f32[128,128], index: 3, kind: input, shape index: {}]   ;;  %s564_s2 = inlined_call_operand.vmem [shape: f32[1,128], index: 2, kind: input, shape index: {}]   ;;  %s565_s4 = inlined_call_operand.vmem [shape: f32[1,128], index: 4, kind: input, shape index: {}]   ;;  %s566_s5 = inlined_call_operand.vmem [shape: f32[16,128], index: 5, kind: output, shape index: {}]  }
   0x1   :  { %v28_v0 = vld [vmem:[%s561_s1] sm:$0xff]  ;;  %v29_v1 = vld [vmem:[%s561_s1 + $0x8] sm:$0xff]  ;;  %v30_v2 = vld [vmem:[%s561_s1 + $0x10] sm:$0xff] }
   0x2   :  { %v353_v3 = vpack.c.bf16 %v29_v1, %v28_v0  ;;  %v31_v4 = vld [vmem:[%s561_s1 + $0x18] sm:$0xff]  ;;  %v32_v6 = vld [vmem:[%s561_s1 + $0x20] sm:$0xff]  ;;  %v33_v7 = vld [vmem:[%s561_s1 + $0x28] sm:$0xff] }
   0x3   :  { %v357_v5 = vpack.c.bf16 %v31_v4, %v30_v2  ;;  %v361_v8 = vpack.c.bf16 %v33_v7, %v32_v6  ;;  %v34_v9 = vld [vmem:[%s561_s1 + $0x30] sm:$0xff]  ;;  %v35_v10 = vld [vmem:[%s561_s1 + $0x38] sm:$0xff]  ;;  %v26_v11 = vld [vmem:[%s562_s0] sm:$0xff] }
   0x4   :  { %354 = vmatprep.subr.bf16.mxu0 %v353_v3  ;;  %315 = vmatprep.mubr.f32.mxu0 %v26_v11  ;;  %v130_v12 = vld [vmem:[%s563_s3] sm:$0xff]  ;;  %v131_v13 = vld [vmem:[%s563_s3 + $0x8] sm:$0xff]  ;;  %v132_v14 = vld [vmem:[%s563_s3 + $0x10] sm:$0xff]  ;;  %v365_v20 = vpack.c.bf16 %v35_v10, %v34_v9 }
   0x5   :  { %356 = vmatpush3.bf16.msra.mxu0 %v353_v3  ;;  %v385_v15 = vpack.c.bf16 %v131_v13, %v130_v12  ;;  %v133_v16 = vld [vmem:[%s563_s3 + $0x18] sm:$0xff]  ;;  %v134_v18 = vld [vmem:[%s563_s3 + $0x20] sm:$0xff]  ;;  %v135_v19 = vld [vmem:[%s563_s3 + $0x28] sm:$0xff] }
   0x6   :  { %358 = vmatprep.subr.bf16.mxu0 %v357_v5  ;;  %v389_v17 = vpack.c.bf16 %v133_v16, %v132_v14  ;;  %v36_v21 = vld [vmem:[%s561_s1 + $0x40] sm:$0xff]  ;;  %v37_v22 = vld [vmem:[%s561_s1 + $0x48] sm:$0xff]  ;;  %v393_v23 = vpack.c.bf16 %v135_v19, %v134_v18  ;;  %v136_v24 = vld [vmem:[%s563_s3 + $0x30] sm:$0xff] }
   0x7   :  { %386 = vmatprep.subr.bf16.mxu1 %v385_v15  ;;  %v137_v25 = vld [vmem:[%s563_s3 + $0x38] sm:$0xff]  ;;  %v369_v26 = vpack.c.bf16 %v37_v22, %v36_v21  ;;  %v38_v27 = vld [vmem:[%s561_s1 + $0x50] sm:$0xff]  ;;  %v138_v30 = vld [vmem:[%s563_s3 + $0x40] sm:$0xff] }
   0x8   :  { %388 = vmatpush3.bf16.msra.mxu1 %v385_v15  ;;  %v39_v28 = vld [vmem:[%s561_s1 + $0x58] sm:$0xff]  ;;  %v397_v29 = vpack.c.bf16 %v137_v25, %v136_v24  ;;  %v139_v31 = vld [vmem:[%s563_s3 + $0x48] sm:$0xff]  ;;  %v40_v33 = vld [vmem:[%s561_s1 + $0x60] sm:$0xff] }
   0x9   :  { %360 = vmatpush3.bf16.msra.mxu0 %v357_v5  ;;  %390 = vmatprep.subr.bf16.mxu1 %v389_v17  ;;  %v373_v32 = vpack.c.bf16 %v39_v28, %v38_v27  ;;  %v41_v34 = vld [vmem:[%s561_s1 + $0x68] sm:$0xff]  ;;  %v401_v35 = vpack.c.bf16 %v139_v31, %v138_v30  ;;  %v140_v36 = vld [vmem:[%s563_s3 + $0x50] sm:$0xff]  ;;  %v141_v37 = vld [vmem:[%s563_s3 + $0x58] sm:$0xff] }
   0xa   :  { %362 = vmatprep.subr.bf16.mxu0 %v361_v8  ;;  %v377_v38 = vpack.c.bf16 %v41_v34, %v40_v33  ;;  %v42_v39 = vld [vmem:[%s561_s1 + $0x70] sm:$0xff]  ;;  %v43_v40 = vld [vmem:[%s561_s1 + $0x78] sm:$0xff]  ;;  %v405_v41 = vpack.c.bf16 %v141_v37, %v140_v36  ;;  %v142_v42 = vld [vmem:[%s563_s3 + $0x60] sm:$0xff] }
   0xb   :  { %v143_v43 = vld [vmem:[%s563_s3 + $0x68] sm:$0xff]  ;;  %v381_v44 = vpack.c.bf16 %v43_v40, %v42_v39  ;;  %v144_v47 = vld [vmem:[%s563_s3 + $0x70] sm:$0xff]  ;;  %v145_v48 = vld [vmem:[%s563_s3 + $0x78] sm:$0xff] }
   0xc   :  { %392 = vmatpush3.bf16.msra.mxu1 %v389_v17  ;;  %v409_v45 = vpack.c.bf16 %v143_v43, %v142_v42  ;;  %v27_v46 = vld [vmem:[%s562_s0 + $0x8] sm:$0xff]  ;;  %v413_v49 = vpack.c.bf16 %v145_v48, %v144_v47  ;;  %v245_v50 = vld [vmem:[%s564_s2] ss:$0 sm:$0xff] }
   0xd   :  { %364 = vmatpush3.bf16.msra.mxu0 %v361_v8  ;;  %394 = vmatprep.subr.bf16.mxu1 %v393_v23  ;;  %v246_v57 = vld [vmem:[%s565_s4] ss:$0 sm:$0xff] }
   0xe   :  { %366 = vmatprep.subr.bf16.mxu0 %v365_v20 }
  0x10   :  { %396 = vmatpush3.bf16.msra.mxu1 %v393_v23 }
  0x11   :  { %368 = vmatpush3.bf16.msra.mxu0 %v365_v20  ;;  %398 = vmatprep.subr.bf16.mxu1 %v397_v29 }
  0x12   :  { %370 = vmatprep.subr.bf16.mxu0 %v369_v26 }
  0x14   :  { %400 = vmatpush3.bf16.msra.mxu1 %v397_v29 }
  0x15   :  { %372 = vmatpush3.bf16.msra.mxu0 %v369_v26  ;;  %402 = vmatprep.subr.bf16.mxu1 %v401_v35 }
  0x16   :  { %374 = vmatprep.subr.bf16.mxu0 %v373_v32 }
  0x18   :  { %404 = vmatpush3.bf16.msra.mxu1 %v401_v35 }
  0x19   :  { %376 = vmatpush3.bf16.msra.mxu0 %v373_v32  ;;  %406 = vmatprep.subr.bf16.mxu1 %v405_v41 }
  0x1a   :  { %378 = vmatprep.subr.bf16.mxu0 %v377_v38 }
  0x1c   :  { %408 = vmatpush3.bf16.msra.mxu1 %v405_v41 }
  0x1d   :  { %380 = vmatpush3.bf16.msra.mxu0 %v377_v38  ;;  %410 = vmatprep.subr.bf16.mxu1 %v409_v45 }
  0x1e   :  { %382 = vmatprep.subr.bf16.mxu0 %v381_v44 }
  0x20   :  { %412 = vmatpush3.bf16.msra.mxu1 %v409_v45 }
  0x21   :  { %384 = vmatpush3.bf16.msra.mxu0 %v381_v44  ;;  %414 = vmatprep.subr.bf16.mxu1 %v413_v49 }
  0x24   :  { %316 = vmatmul.mubr.f32.vlgmr.msra.gmra.mrb[0].mxu0 %v27_v46  ;;  %416 = vmatpush3.bf16.msra.mxu1 %v413_v49 }
  0xf7   :  { %v317_v51 = vpop.f32.mrb[0].mxu0 }
  0xf8   :  { %v123_v52 = vadd.f32 %v317_v51, %v245_v50  ;;  %v117_v53 = vpop.f32.mrb[1].mxu0 }
  0xf9   :  { %v118_v54 = vadd.f32 %v245_v50, %v117_v53 }
  0xfa   :  { %v127_v56 = vmax.f32 %v123_v52, 0.0 }
  0xfb   :  { %v126_v55 = vmax.f32 %v118_v54, 0.0 }
  0xfd   :  { %350 = vmatprep.mubr.f32.mxu1 %v126_v55 }
  0xfe   :  { %351 = vmatmul.mubr.f32.vlgmr.msra.gmra.mrb[0].mxu1 %v127_v56 }
 0x1d1   :  { %v352_v58 = vpop.f32.mrb[0].mxu1 }
 0x1d2   :  { %v238_v59 = vadd.f32 %v352_v58, %v246_v57  ;;  %v212_v60 = vpop.f32.mrb[1].mxu1 }
 0x1d3   :  { %v237_v61 = vadd.f32 %v246_v57, %v212_v60 }
 0x1d4   :  { %240 = vst [vmem:[%s566_s5 + $0x8] sm:$0xff] %v238_v59 }
 0x1d5   :  { %239 = vst [vmem:[%s566_s5] sm:$0xff] %v237_v61 }

</bundles_post_ra>
